<compile_context>
chip_gen: v7x
topology: tpu7x:2x2x1
jax: 0.10.0
libtpu: 0.0.40
codegen_flags: <defaults>
</compile_context>

<pallas_src>
import jax
import jax.numpy as jnp
from jax import lax
from jax.experimental import pallas as pl
from jax.experimental.pallas import tpu as pltpu


# ---------------------------------------------------------------------------
# Kernel
# ---------------------------------------------------------------------------
def critic_kernel(state_ref, action_ref, w1s_ref, w1a_ref, b1_ref,
                  w2_ref, b2_ref, w3_ref, b3_ref, q_ref):
    # state_ref:(TB,S)  action_ref:(TB,A)
    # w1s_ref:(S,H) w1a_ref:(A,H) b1_ref:(1,H)
    # w2_ref:(H,H)  b2_ref:(1,H)
    # w3_ref:(1,H)  b3_ref:(1,1) in SMEM
    # q_ref:(1,TB)  <- lane-dense output row

    # Layer 1: fused "concat" -> split matmul (both halves hit the MXU), f32 acc.
    h1 = (jnp.dot(state_ref[...], w1s_ref[...], preferred_element_type=jnp.float32)
          + jnp.dot(action_ref[...], w1a_ref[...], preferred_element_type=jnp.float32)
          + b1_ref[...])
    h1 = jnp.maximum(h1, 0.0)                                   # ReLU (VPU)

    # Layer 2: MXU matmul with f32 accumulation (operands may be bf16).
    h2 = jnp.dot(h1.astype(w2_ref.dtype), w2_ref[...],
                 preferred_element_type=jnp.float32) + b2_ref[...]
    h2 = jnp.maximum(h2, 0.0)                                   # ReLU (VPU)

    # Layer 3 (out_features == 1), produced lane-dense:
    #   q(1,TB) = w3(1,H) @ h2(TB,H)^T   (rhs-transposed matmul, f32 accumulation)
    q = lax.dot_general(w3_ref[...], h2.astype(w3_ref.dtype),
                        dimension_numbers=(((1,), (1,)), ((), ())),
                        preferred_element_type=jnp.float32)
    q_ref[...] = (q + b3_ref[0, 0]).astype(q_ref.dtype)          # (1, TB) dense store


# ---------------------------------------------------------------------------
# One-time parameter preparation (do NOT call per forward)
# ---------------------------------------------------------------------------
def prepare_critic_params(params, state_dim, compute_dtype=jnp.float32):
    """Split W1 at the state/action boundary and transpose PyTorch-convention
    (out, in) weights to (in, out).  `compute_dtype=jnp.bfloat16` is recommended
    on ALL TPU generations (v5e/v6e/v7x MXUs are bf16-native); accumulation,
    biases and the output stay f32."""
    w1, b1, w2, b2, w3, b3 = params
    w1_s = jnp.asarray(w1[:, :state_dim].T, dtype=compute_dtype)   # (S, H)
    w1_a = jnp.asarray(w1[:, state_dim:].T, dtype=compute_dtype)   # (A, H)
    w2_t = jnp.asarray(w2.T, dtype=compute_dtype)                  # (H, H)
    w3_r = jnp.asarray(w3, dtype=compute_dtype)                    # (1, H) row
    b1_r = b1[None, :].astype(jnp.float32)                         # (1, H)
    b2_r = b2[None, :].astype(jnp.float32)                         # (1, H)
    b3_s = b3.reshape(1, 1).astype(jnp.float32)                    # (1, 1) scalar
    return (w1_s, w1_a, b1_r, w2_t, b2_r, w3_r, b3_s)


# ---------------------------------------------------------------------------
# Wrapper
# ---------------------------------------------------------------------------
def _round_up(x, m):
    return ((x + m - 1) // m) * m


def _tensorcores_per_chip():
    """Best-effort count of TensorCores a 'parallel' grid axis can shard across."""
    try:
        dev = jax.devices()[0]
        if dev.platform != "tpu":
            return 1
        kind = (getattr(dev, "device_kind", "") or "").lower()
        if "v7" in kind:
            return 2
        nc = getattr(dev, "num_cores", None)
        return max(1, int(nc)) if nc else 1
    except Exception:
        return 1


def critic_forward(state, action, prepared, *, block_batch=2048, tensorcores=None):
    """Pallas implementation of Critic.forward(state, action) -> (B, 1)."""
    w1_s, w1_a, b1_r, w2_t, b2_r, w3_r, b3_s = prepared
    B, S = state.shape
    A = action.shape[1]
    H = w2_t.shape[0]

    compute_dtype = w1_s.dtype
    state = state.astype(compute_dtype)
    action = action.astype(compute_dtype)

    num_tc = _tensorcores_per_chip() if tensorcores is None else max(1, int(tensorcores))
    block_batch = max(128, (block_batch // 128) * 128)   # keep tiles 128-aligned

    # Batch tile selection:
    #  * multi-TC chips get >= num_tc tiles so both TensorCores do work,
    #  * otherwise one exact full-batch tile when it fits,
    #  * otherwise fixed 128-aligned tiles streamed over a 1-D grid.
    if num_tc > 1 and B >= 256:
        TB = min(block_batch, _round_up(pl.cdiv(B, num_tc), 128))
    elif B <= block_batch:
        TB = B
    else:
        TB = block_batch

    num_tiles = pl.cdiv(B, TB)
    B_pad = num_tiles * TB          # ragged last tile: OOB input rows are garbage
    grid = (num_tiles,)             # but row-independent; padded outputs sliced off.

    # Advisory cost estimate so XLA can schedule around the custom call.
    flops = 2 * B * ((S + A) * H + H * H + H)
    nbytes = lambda x: int(x.size) * x.dtype.itemsize
    bytes_accessed = (nbytes(state) + nbytes(action)
                      + sum(nbytes(p) for p in prepared) + B * 4)

    out = pl.pallas_call(
        critic_kernel,
        out_shape=jax.ShapeDtypeStruct((1, B_pad), jnp.float32),
        grid=grid,
        in_specs=[
            # Activation tiles stream over the batch grid (double-buffered).
            pl.BlockSpec((TB, S), lambda i: (i, 0)),
            pl.BlockSpec((TB, A), lambda i: (i, 0)),
            # Weights / biases: constant index_map -> VMEM-resident across tiles.
            pl.BlockSpec((S, H), lambda i: (0, 0)),
            pl.BlockSpec((A, H), lambda i: (0, 0)),
            pl.BlockSpec((1, H), lambda i: (0, 0)),
            pl.BlockSpec((H, H), lambda i: (0, 0)),
            pl.BlockSpec((1, H), lambda i: (0, 0)),
            pl.BlockSpec((1, H), lambda i: (0, 0)),
            # Scalar bias b3 lives in SMEM.
            pl.BlockSpec(memory_space=pltpu.MemorySpace.SMEM),
        ],
        # Lane-dense output: (1, TB) blocks tiled along the lane axis.
        out_specs=pl.BlockSpec((1, TB), lambda i: (0, i)),
        compiler_params=pltpu.CompilerParams(
            dimension_semantics=("parallel",),
            vmem_limit_bytes=32 * 1024 * 1024),
        cost_estimate=pl.CostEstimate(
            flops=flops, transcendentals=0, bytes_accessed=bytes_accessed),
    )(state, action, w1_s, w1_a, b1_r, w2_t, b2_r, w3_r, b3_s)

    # Back to the module's (B, 1) shape; drop padded batch positions.
    return out[0, :B].reshape(B, 1)


# ---------------------------------------------------------------------------
# Init + plain-JAX reference (matches the PyTorch forward exactly)
# ---------------------------------------------------------------------------
def init_critic_params(key, state_dim, action_dim):
    """Deterministic init mimicking torch.nn.Linear default U(-1/sqrt(fan_in), ...)."""
    def linear(key, fan_in, fan_out):
        kw, kb = jax.random.split(key)
        bound = 1.0 / jnp.sqrt(fan_in)
        w = jax.random.uniform(kw, (fan_out, fan_in), jnp.float32, -bound, bound)
        b = jax.random.uniform(kb, (fan_out,), jnp.float32, -bound, bound)
        return w, b

    k1, k2, k3 = jax.random.split(key, 3)
    w1, b1 = linear(k1, state_dim + action_dim, 256)
    w2, b2 = linear(k2, 256, 256)
    w3, b3 = linear(k3, 256, 1)
    return (w1, b1, w2, b2, w3, b3)


def critic_reference(state, action, params):
    w1, b1, w2, b2, w3, b3 = params
    sa = jnp.concatenate([state, action], axis=1)
    q = jax.nn.relu(sa @ w1.T + b1)
    q = jax.nn.relu(q @ w2.T + b2)
    q = q @ w3.T + b3
    return q


if __name__ == "__main__":
    state_dim, action_dim = 16, 8

    key = jax.random.PRNGKey(0)
    k_params, k_state, k_action = jax.random.split(key, 3)
    params = init_critic_params(k_params, state_dim, action_dim)

    # --- small-batch check (single exact tile), f32 compute ---
    B = 4
    state = jax.random.normal(k_state, (B, state_dim), jnp.float32)
    action = jax.random.normal(k_action, (B, action_dim), jnp.float32)

    prepared = prepare_critic_params(params, state_dim)            # one-time prep
    q = jax.block_until_ready(critic_forward(state, action, prepared))
    q_ref = critic_reference(state, action, params)
    assert q.shape == (B, 1), q.shape
    assert jnp.allclose(q, q_ref, atol=1e-4, rtol=1e-4), (q, q_ref)

    # --- multi-tile grid check (non-divisible batch exercises ragged padding) ---
    B2 = 300
    k_s2, k_a2 = jax.random.split(jax.random.PRNGKey(1))
    state2 = jax.random.normal(k_s2, (B2, state_dim), jnp.float32)
    action2 = jax.random.normal(k_a2, (B2, action_dim), jnp.float32)
    q2 = jax.block_until_ready(
        critic_forward(state2, action2, prepared, block_batch=128))
    q2_ref = critic_reference(state2, action2, params)
    assert q2.shape == (B2, 1), q2.shape
    assert jnp.allclose(q2, q2_ref, atol=1e-4, rtol=1e-4)

    # --- forced 2-TensorCore split path (v7x-style batch sharding) ---
    q3 = jax.block_until_ready(
        critic_forward(state2, action2, prepared, tensorcores=2))
    assert q3.shape == (B2, 1), q3.shape
    assert jnp.allclose(q3, q2_ref, atol=1e-4, rtol=1e-4)

    # --- bf16 matmul-operand path (recommended on all gens), f32 accumulation ---
    prepared_bf16 = prepare_critic_params(params, state_dim,
                                          compute_dtype=jnp.bfloat16)
    q_bf16 = jax.block_until_ready(critic_forward(state, action, prepared_bf16))
    assert jnp.allclose(q_bf16, q_ref, atol=1e-1, rtol=1e-1)

    print("KERNEL_OK")
</pallas_src>

<mosaic_0001>
module attributes {stable_mosaic.version = 11 : i64} {
  func.func @critic_kernel(%arg0: i32, %arg1: memref<4x16xf32, #tpu.memory_space<vmem>>, %arg2: memref<4x8xf32, #tpu.memory_space<vmem>>, %arg3: memref<16x256xf32, #tpu.memory_space<vmem>>, %arg4: memref<8x256xf32, #tpu.memory_space<vmem>>, %arg5: memref<1x256xf32, #tpu.memory_space<vmem>>, %arg6: memref<256x256xf32, #tpu.memory_space<vmem>>, %arg7: memref<1x256xf32, #tpu.memory_space<vmem>>, %arg8: memref<1x256xf32, #tpu.memory_space<vmem>>, %arg9: memref<1x1xf32, #tpu.memory_space<smem>>, %arg10: memref<1x4xf32, #tpu.memory_space<vmem>>) attributes {dimension_semantics = [#tpu.dimension_semantics<parallel>], iteration_bounds = array<i64: 1>, scalar_prefetch = 0 : i64, scratch_operands = 0 : i64, tpu.core_type = #tpu.core_type<tc>, window_params = [{transform_indices = @transform_0, window_bounds = array<i64: 4, 16>}, {transform_indices = @transform_1, window_bounds = array<i64: 4, 8>}, {pipeline_mode = #tpu.pipeline_mode<synchronous>, transform_indices = @transform_2, window_bounds = array<i64: 16, 256>}, {pipeline_mode = #tpu.pipeline_mode<synchronous>, transform_indices = @transform_3, window_bounds = array<i64: 8, 256>}, {pipeline_mode = #tpu.pipeline_mode<synchronous>, transform_indices = @transform_4, window_bounds = array<i64: 1, 256>}, {pipeline_mode = #tpu.pipeline_mode<synchronous>, transform_indices = @transform_5, window_bounds = array<i64: 256, 256>}, {pipeline_mode = #tpu.pipeline_mode<synchronous>, transform_indices = @transform_6, window_bounds = array<i64: 1, 256>}, {pipeline_mode = #tpu.pipeline_mode<synchronous>, transform_indices = @transform_7, window_bounds = array<i64: 1, 256>}, {transform_indices = @transform_8, window_bounds = array<i64: 1, 1>}, {transform_indices = @transform_9, window_bounds = array<i64: 1, 4>}]} {
    %c0 = arith.constant 0 : index
    %c0_0 = arith.constant 0 : index
    %0 = vector.load %arg1[%c0, %c0_0] : memref<4x16xf32, #tpu.memory_space<vmem>>, vector<4x16xf32>
    %c0_1 = arith.constant 0 : index
    %c0_2 = arith.constant 0 : index
    %1 = vector.load %arg3[%c0_1, %c0_2] : memref<16x256xf32, #tpu.memory_space<vmem>>, vector<16x256xf32>
    %cst = arith.constant dense<0.000000e+00> : vector<4x256xf32>
    %2 = tpu.matmul %0, %1, %cst {dimension_numbers = #tpu.dot_dimension_numbers<[1], [0], [0], [1], [0, 0, 1, 1], [], []>} : vector<4x16xf32>, vector<16x256xf32>, vector<4x256xf32> -> vector<4x256xf32>
    %c0_3 = arith.constant 0 : index
    %c0_4 = arith.constant 0 : index
    %3 = vector.load %arg2[%c0_3, %c0_4] : memref<4x8xf32, #tpu.memory_space<vmem>>, vector<4x8xf32>
    %c0_5 = arith.constant 0 : index
    %c0_6 = arith.constant 0 : index
    %4 = vector.load %arg4[%c0_5, %c0_6] : memref<8x256xf32, #tpu.memory_space<vmem>>, vector<8x256xf32>
    %cst_7 = arith.constant dense<0.000000e+00> : vector<4x256xf32>
    %5 = tpu.matmul %3, %4, %cst_7 {dimension_numbers = #tpu.dot_dimension_numbers<[1], [0], [0], [1], [0, 0, 1, 1], [], []>} : vector<4x8xf32>, vector<8x256xf32>, vector<4x256xf32> -> vector<4x256xf32>
    %6 = arith.addf %2, %5 : vector<4x256xf32>
    %c0_8 = arith.constant 0 : index
    %c0_9 = arith.constant 0 : index
    %7 = vector.load %arg5[%c0_8, %c0_9] : memref<1x256xf32, #tpu.memory_space<vmem>>, vector<1x256xf32>
    %8 = vector.broadcast %7 : vector<1x256xf32> to vector<4x256xf32>
    %9 = arith.addf %6, %8 : vector<4x256xf32>
    %cst_10 = arith.constant 0.000000e+00 : f32
    %10 = vector.broadcast %cst_10 : f32 to vector<4x256xf32>
    %11 = arith.maximumf %9, %10 : vector<4x256xf32>
    %c0_11 = arith.constant 0 : index
    %c0_12 = arith.constant 0 : index
    %12 = vector.load %arg6[%c0_11, %c0_12] : memref<256x256xf32, #tpu.memory_space<vmem>>, vector<256x256xf32>
    %cst_13 = arith.constant dense<0.000000e+00> : vector<4x256xf32>
    %13 = tpu.matmul %11, %12, %cst_13 {dimension_numbers = #tpu.dot_dimension_numbers<[1], [0], [0], [1], [0, 0, 1, 1], [], []>} : vector<4x256xf32>, vector<256x256xf32>, vector<4x256xf32> -> vector<4x256xf32>
    %c0_14 = arith.constant 0 : index
    %c0_15 = arith.constant 0 : index
    %14 = vector.load %arg7[%c0_14, %c0_15] : memref<1x256xf32, #tpu.memory_space<vmem>>, vector<1x256xf32>
    %15 = vector.broadcast %14 : vector<1x256xf32> to vector<4x256xf32>
    %16 = arith.addf %13, %15 : vector<4x256xf32>
    %cst_16 = arith.constant 0.000000e+00 : f32
    %17 = vector.broadcast %cst_16 : f32 to vector<4x256xf32>
    %18 = arith.maximumf %16, %17 : vector<4x256xf32>
    %c0_17 = arith.constant 0 : index
    %c0_18 = arith.constant 0 : index
    %19 = vector.load %arg8[%c0_17, %c0_18] : memref<1x256xf32, #tpu.memory_space<vmem>>, vector<1x256xf32>
    %cst_19 = arith.constant dense<0.000000e+00> : vector<1x4xf32>
    %20 = tpu.matmul %19, %18, %cst_19 {dimension_numbers = #tpu.dot_dimension_numbers<[1], [1], [0], [0], [0, 0, 1, 0], [], []>} : vector<1x256xf32>, vector<4x256xf32>, vector<1x4xf32> -> vector<1x4xf32>
    %c0_20 = arith.constant 0 : index
    %c0_21 = arith.constant 0 : index
    %21 = memref.load %arg9[%c0_20, %c0_21] : memref<1x1xf32, #tpu.memory_space<smem>>
    %22 = vector.broadcast %21 : f32 to vector<1x4xf32>
    %23 = arith.addf %20, %22 : vector<1x4xf32>
    %c0_22 = arith.constant 0 : index
    %c0_23 = arith.constant 0 : index
    %24 = vector.load %arg10[%c0_22, %c0_23] : memref<1x4xf32, #tpu.memory_space<vmem>>, vector<1x4xf32>
    tpu.vector_store %arg10[%c0_22, %c0_23], %23 {strides = array<i32>} : memref<1x4xf32, #tpu.memory_space<vmem>>, vector<1x4xf32>,
    return
  }
  func.func @transform_0(%arg0: i32) -> (i32, i32) {
    %c0_i32 = arith.constant 0 : i32
    %c0_i32_0 = arith.constant 0 : i32
    return %arg0, %c0_i32 : i32, i32
  }
  func.func @transform_1(%arg0: i32) -> (i32, i32) {
    %c0_i32 = arith.constant 0 : i32
    %c0_i32_0 = arith.constant 0 : i32
    return %arg0, %c0_i32 : i32, i32
  }
  func.func @transform_2(%arg0: i32) -> (i32, i32) {
    %c0_i32 = arith.constant 0 : i32
    %c0_i32_0 = arith.constant 0 : i32
    %c0_i32_1 = arith.constant 0 : i32
    return %c0_i32, %c0_i32_0 : i32, i32
  }
  func.func @transform_3(%arg0: i32) -> (i32, i32) {
    %c0_i32 = arith.constant 0 : i32
    %c0_i32_0 = arith.constant 0 : i32
    %c0_i32_1 = arith.constant 0 : i32
    return %c0_i32, %c0_i32_0 : i32, i32
  }
  func.func @transform_4(%arg0: i32) -> (i32, i32) {
    %c0_i32 = arith.constant 0 : i32
    %c0_i32_0 = arith.constant 0 : i32
    %c0_i32_1 = arith.constant 0 : i32
    return %c0_i32, %c0_i32_0 : i32, i32
  }
  func.func @transform_5(%arg0: i32) -> (i32, i32) {
    %c0_i32 = arith.constant 0 : i32
    %c0_i32_0 = arith.constant 0 : i32
    %c0_i32_1 = arith.constant 0 : i32
    return %c0_i32, %c0_i32_0 : i32, i32
  }
  func.func @transform_6(%arg0: i32) -> (i32, i32) {
    %c0_i32 = arith.constant 0 : i32
    %c0_i32_0 = arith.constant 0 : i32
    %c0_i32_1 = arith.constant 0 : i32
    return %c0_i32, %c0_i32_0 : i32, i32
  }
  func.func @transform_7(%arg0: i32) -> (i32, i32) {
    %c0_i32 = arith.constant 0 : i32
    %c0_i32_0 = arith.constant 0 : i32
    %c0_i32_1 = arith.constant 0 : i32
    return %c0_i32, %c0_i32_0 : i32, i32
  }
  func.func @transform_8(%arg0: i32) -> (i32, i32) {
    %c0_i32 = arith.constant 0 : i32
    %c0_i32_0 = arith.constant 0 : i32
    %c0_i32_1 = arith.constant 0 : i32
    return %c0_i32, %c0_i32_0 : i32, i32
  }
  func.func @transform_9(%arg0: i32) -> (i32, i32) {
    %c0_i32 = arith.constant 0 : i32
    %c0_i32_0 = arith.constant 0 : i32
    return %c0_i32, %arg0 : i32, i32
  }
}

</mosaic_0001>

<bundles_post_ra>
// kernel: tpu_custom_call.1
= control target key start
LH: loop header
LB: loop body
LE: loop exit
PB: predicated region body
PF: predicated region fallthrough
CT: control target
= control target key end

     0   :  { %15 = vsyncpa [#allocation4], 0  ;;  %s848_s0 = inlined_call_operand.hbm [shape: f32[4,16], index: 0, kind: input, shape index: {}]   ;;  %s849_s1 = inlined_call_operand.vmem [shape: f32[4,8], index: 1, kind: input, shape index: {}]   ;;  %s850_s2 = inlined_call_operand.hbm [shape: f32[16,256], index: 2, kind: input, shape index: {}]   ;;  %s851_s3 = inlined_call_operand.hbm [shape: f32[8,256], index: 3, kind: input, shape index: {}]   ;;  %s852_s4 = inlined_call_operand.vmem [shape: f32[1,256], index: 4, kind: input, shape index: {}]   ;;  %s853_s5 = inlined_call_operand.hbm [shape: f32[256,256], index: 5, kind: input, shape index: {}]   ;;  %s854_s6 = inlined_call_operand.vmem [shape: f32[1,256], index: 6, kind: input, shape index: {}]   ;;  %s855_s7 = inlined_call_operand.vmem [shape: f32[1,256], index: 7, kind: input, shape index: {}]   ;;  %s856_s8 = inlined_call_operand.<no memory space> [shape: f32[1,1], index: 8, kind: input, shape index: {}]   ;;  %s857_s9 = inlined_call_operand.hbm [shape: f32[1,4], index: 9, kind: output, shape index: {}]  }
   0x1   :  { %16 = vsyncpa [#allocation7], 0 }
   0x2   :  { %17 = vsyncpa [#allocation10], 0 }
   0x3   :  { %18 = vsyncpa [#allocation5], 0  ;;  %s709_s30 = smov [#allocation6]   ;;  %s591_s13 = scalar_lea.hbm %s850_s2, 512 }
   0x4   :  { %s36_s10 = sshll.u32 %s709_s30, 4  ;;  %p592_p0 = scmp.ne.s32.totalorder %s850_s2, %s591_s13  ;;  %s37_s10 = int_to_ptr.vmem [resolvable:$true] %s36_s10 }
   0x5   :  { %p595_p1 = scmp.lt.u32.totalorder %s591_s13, %s850_s2 }
   0x7   :  { %p597_p2 = pnand %p595_p1, %p592_p0 }
   0x9   :  { %600 = shalt.err (!%p597_p2)
}
   0xa   :  { %s601_s18 = scalar_lea.vmem %s37_s10, 512  ;;  %p606_p4 = scmp.lt.s32.totalorder %s37_s10, %s37_s10 }
   0xb   :  { %p602_p3 = scmp.ne.s32.totalorder %s37_s10, %s601_s18  ;;  %p607_p5 = scmp.lt.s32.totalorder %s601_s18, %s601_s18 }
   0xd   :  { %p608_p6 = por %p607_p5, %p606_p4 }
   0xf   :  { %p609_p7 = pnand %p608_p6, %p602_p3 }
  0x11   :  { %612 = shalt.err (!%p609_p7)
}
  0x12   :  { %s710_s19 = smov 256   ;;  %s711_s20 = smov 16  }
  0x13   :  { %42 = dma.hbm_to_vmem [thread:$0]  %s850_s2, 512, %s37_s10, [#allocation7], %s710_s19, %s710_s19, %s711_s20  }
  0x14   :  { %s712_s23 = smov [#allocation3]   ;;  %s713_s25 = smov [#allocation8]  }
  0x15   :  { %s25_s24 = sshll.u32 %s712_s23, 4  ;;  %s49_s26 = sshll.u32 %s713_s25, 4  ;;  %s26_s24 = int_to_ptr.vmem [resolvable:$true] %s25_s24  ;;  %s50_s26 = int_to_ptr.vmem [resolvable:$true] %s49_s26 }
  0x16   :  { %s613_s29 = scalar_lea.hbm %s848_s0, 64 }
  0x17   :  { %p614_p8 = scmp.ne.s32.totalorder %s848_s0, %s613_s29  ;;  %p617_p9 = scmp.lt.u32.totalorder %s613_s29, %s848_s0 }
  0x19   :  { %p619_p10 = pnand %p617_p9, %p614_p8 }
  0x1b   :  { %622 = shalt.err (!%p619_p10)
}
  0x1c   :  { %s623_s2 = scalar_lea.vmem %s26_s24, 64  ;;  %p628_p12 = scmp.lt.s32.totalorder %s26_s24, %s26_s24 }
  0x1d   :  { %p624_p11 = scmp.ne.s32.totalorder %s26_s24, %s623_s2  ;;  %p629_p13 = scmp.lt.s32.totalorder %s623_s2, %s623_s2 }
  0x1f   :  { %p630_p0 = por %p629_p13, %p628_p12 }
  0x21   :  { %p631_p1 = pnand %p630_p0, %p624_p11 }
  0x23   :  { %634 = shalt.err (!%p631_p1)
}
  0x24   :  { %28 = dma.hbm_to_vmem [thread:$0]  %s848_s0, 64, %s26_s24, [#allocation4]  }
  0x25   :  { %s635_s17 = scalar_lea.hbm %s851_s3, 256 }
  0x26   :  { %p636_p2 = scmp.ne.s32.totalorder %s851_s3, %s635_s17  ;;  %p639_p3 = scmp.lt.u32.totalorder %s635_s17, %s851_s3 }
  0x28   :  { %p641_p4 = pnand %p639_p3, %p636_p2 }
  0x2a   :  { %644 = shalt.err (!%p641_p4)
}
  0x2b   :  { %s645_s25 = scalar_lea.vmem %s50_s26, 256  ;;  %p650_p6 = scmp.lt.s32.totalorder %s50_s26, %s50_s26 }
  0x2c   :  { %p646_p5 = scmp.ne.s32.totalorder %s50_s26, %s645_s25  ;;  %p651_p7 = scmp.lt.s32.totalorder %s645_s25, %s645_s25 }
  0x2e   :  { %p652_p8 = por %p651_p7, %p650_p6 }
  0x30   :  { %p653_p9 = pnand %p652_p8, %p646_p5 }
  0x32   :  { %656 = shalt.err (!%p653_p9)
}
  0x33   :  { %52 = dma.hbm_to_vmem [thread:$0]  %s851_s3, 256, %s50_s26, [#allocation7]  }
  0x34   :  { %s714_s27 = smov [#allocation9]   ;;  %s657_s11 = scalar_lea.hbm %s853_s5, 8192 }
  0x35   :  { %s60_s28 = sshll.u32 %s714_s27, 4  ;;  %p658_p10 = scmp.ne.s32.totalorder %s853_s5, %s657_s11  ;;  %s61_s28 = int_to_ptr.vmem [resolvable:$true] %s60_s28 }
  0x36   :  { %p661_p11 = scmp.lt.u32.totalorder %s657_s11, %s853_s5 }
  0x38   :  { %p663_p12 = pnand %p661_p11, %p658_p10 }
  0x3a   :  { %666 = shalt.err (!%p663_p12)
}
  0x3b   :  { %s667_s14 = scalar_lea.vmem %s61_s28, 8192  ;;  %p672_p0 = scmp.lt.s32.totalorder %s61_s28, %s61_s28 }
  0x3c   :  { %p668_p13 = scmp.ne.s32.totalorder %s61_s28, %s667_s14  ;;  %p673_p1 = scmp.lt.s32.totalorder %s667_s14, %s667_s14 }
  0x3e   :  { %p674_p2 = por %p673_p1, %p672_p0 }
  0x40   :  { %p675_p3 = pnand %p674_p2, %p668_p13 }
  0x42   :  { %678 = shalt.err (!%p675_p3)
}
  0x43   :  { %66 = dma.hbm_to_vmem [thread:$0]  %s853_s5, 8192, %s61_s28, [#allocation10], %s710_s19, %s710_s19, %s711_s20  }
  0x44   :  { %701 = dma.done.wait [#allocation4], 64  }
  0x45   :  { %702 = vsyncadd [#allocation4], 4294967232 }
  0x46   :  { %703 = dma.done.wait [#allocation7], 768  }
  0x47   :  { %704 = vsyncadd [#allocation7], 4294966528 }
  0x48   :  { %705 = dma.done.wait [#allocation10], 8192  }
  0x49   :  { %706 = vsyncadd [#allocation10], 4294959104  ;;  %v715_v0 = vmov 0.0   ;;  %v92_v1 = vld [vmem:[#allocation8 + $0x8] sm:$0xff]  ;;  %v91_v2 = vld [vmem:[#allocation8] sm:$0xff]  ;;  %vm93_vm0 = vcmask 64512  }
  0x4a   :  { %161 = vmatprep.mubr.f32.mxu0 %v715_v0  ;;  %v90_v3 = vld [vmem:[%s849_s1] sm:$0xf]  ;;  %97 = vmatprep.subr.mxu0 %v92_v1  ;;  %v87_v4 = vld [vmem:[#allocation6 + $0x8] sm:$0xff]  ;;  %v86_v6 = vld [vmem:[#allocation6] sm:$0xff]  ;;  %vm168_vm1 = vcmask 130048   ;;  %s716_s21 = smov [#allocation11]  }
  0x4b   :  { %v89_v5 = vld [vmem:[#allocation6 + $0x18] sm:$0xff]  ;;  %98 = vmatpush1.msra.mxu0 %v91_v2  ;;  %v88_v8 = vld [vmem:[#allocation6 + $0x10] sm:$0xff]  ;;  %v262_v11 = vld [vmem:[#allocation9 + $0x18] sm:$0xff]  ;;  %s500_s22 = sshll.u32 %s716_s21, 4  ;;  %vm492_vm2 = vcmask 24576   ;;  %s501_s22 = int_to_ptr.vmem [resolvable:$true] %s500_s22 }
  0x4c   :  { %v513_v7 = vpack.c.bf16 %v89_v5, %v87_v4  ;;  %v260_v9 = vld [vmem:[#allocation9 + $0x8] sm:$0xff]  ;;  %511 = vmatmul.mubr.msk.f32.vlgmr.msra.gmra.mrb[0].mxu0 %vm93_vm0, %v90_v3  ;;  %v515_v10 = vpack.c.bf16 %v88_v8, %v86_v6  ;;  %v259_v12 = vld [vmem:[#allocation9] sm:$0xff]  ;;  %v261_v13 = vld [vmem:[#allocation9 + $0x10] sm:$0xff]  ;;  %s683_s23 = scalar_lea.vmem %s501_s22, 32  ;;  %p684_p5 = scmp.lt.s32.totalorder %s501_s22, %s501_s22 }
  0x4d   :  { %236 = vmatprep.mubr.f32.mxu0 %v715_v0  ;;  %v517_v14 = vpack.c.bf16 %v262_v11, %v260_v9  ;;  %v519_v15 = vpack.c.bf16 %v261_v13, %v259_v12  ;;  %v264_v16 = vld [vmem:[#allocation9 + $0x28] sm:$0xff]  ;;  %v266_v17 = vld [vmem:[#allocation9 + $0x38] sm:$0xff]  ;;  %v263_v18 = vld [vmem:[#allocation9 + $0x20] sm:$0xff] }
  0x4e   :  { %514 = vmatprep.subr.bf16.mxu0 %v513_v7  ;;  %v521_v19 = vpack.c.bf16 %v266_v17, %v264_v16  ;;  %v265_v20 = vld [vmem:[#allocation9 + $0x30] sm:$0xff]  ;;  %v268_v21 = vld [vmem:[#allocation9 + $0x48] sm:$0xff]  ;;  %v270_v22 = vld [vmem:[#allocation9 + $0x58] sm:$0xff] }
  0x4f   :  { %516 = vmatpush1.bf16.msra.mxu0 %v515_v10  ;;  %518 = vmatprep.subr.bf16.mxu1 %v517_v14  ;;  %v523_v23 = vpack.c.bf16 %v265_v20, %v263_v18  ;;  %v85_v24 = vld [vmem:[#allocation3] sm:$0xf]  ;;  %v525_v25 = vpack.c.bf16 %v270_v22, %v268_v21  ;;  %v267_v26 = vld [vmem:[#allocation9 + $0x40] sm:$0xff]  ;;  %v269_v27 = vld [vmem:[#allocation9 + $0x50] sm:$0xff] }
  0x50   :  { %520 = vmatpush1.bf16.msra.mxu1 %v519_v15  ;;  %v272_v28 = vld [vmem:[#allocation9 + $0x68] sm:$0xff]  ;;  %v274_v29 = vld [vmem:[#allocation9 + $0x78] sm:$0xff]  ;;  %v527_v30 = vpack.c.bf16 %v269_v27, %v267_v26  ;;  %v271_v32 = vld [vmem:[#allocation9 + $0x60] sm:$0xff] }
  0x51   :  { %522 = vmatprep.subr.bf16.mxu1 %v521_v19  ;;  %v529_v31 = vpack.c.bf16 %v274_v29, %v272_v28  ;;  %v273_v33 = vld [vmem:[#allocation9 + $0x70] sm:$0xff]  ;;  %v276_v34 = vld [vmem:[#allocation9 + $0x88] sm:$0xff]  ;;  %v278_v35 = vld [vmem:[#allocation9 + $0x98] sm:$0xff] }
  0x52   :  { %v531_v36 = vpack.c.bf16 %v273_v33, %v271_v32  ;;  %v533_v37 = vpack.c.bf16 %v278_v35, %v276_v34  ;;  %v275_v38 = vld [vmem:[#allocation9 + $0x80] sm:$0xff]  ;;  %v277_v39 = vld [vmem:[#allocation9 + $0x90] sm:$0xff]  ;;  %v280_v40 = vld [vmem:[#allocation9 + $0xa8] sm:$0xff] }
  0x53   :  { %v282_v41 = vld [vmem:[#allocation9 + $0xb8] sm:$0xff]  ;;  %v535_v42 = vpack.c.bf16 %v277_v39, %v275_v38  ;;  %v279_v44 = vld [vmem:[#allocation9 + $0xa0] sm:$0xff]  ;;  %v281_v45 = vld [vmem:[#allocation9 + $0xb0] sm:$0xff] }
  0x54   :  { %512 = vmatmul.mubr.msk.f32.vlgmr.msra.gmra.mrb[0].mxu0 %vm168_vm1, %v85_v24  ;;  %524 = vmatpush1.bf16.msra.mxu1 %v523_v23  ;;  %v537_v43 = vpack.c.bf16 %v282_v41, %v280_v40  ;;  %v284_v46 = vld [vmem:[#allocation9 + $0xc8] sm:$0xff]  ;;  %v286_v47 = vld [vmem:[#allocation9 + $0xd8] sm:$0xff]  ;;  %v539_v48 = vpack.c.bf16 %v281_v45, %v279_v44  ;;  %v283_v50 = vld [vmem:[#allocation9 + $0xc0] sm:$0xff] }
  0x55   :  { %526 = vmatprep.subr.bf16.mxu1 %v525_v25  ;;  %v541_v49 = vpack.c.bf16 %v286_v47, %v284_v46  ;;  %v285_v51 = vld [vmem:[#allocation9 + $0xd0] sm:$0xff]  ;;  %v288_v52 = vld [vmem:[#allocation9 + $0xe8] sm:$0xff]  ;;  %v290_v53 = vld [vmem:[#allocation9 + $0xf8] sm:$0xff] }
  0x56   :  { %v543_v54 = vpack.c.bf16 %v285_v51, %v283_v50  ;;  %v545_v55 = vpack.c.bf16 %v290_v53, %v288_v52  ;;  %v287_v56 = vld [vmem:[#allocation9 + $0xe0] sm:$0xff]  ;;  %v289_v57 = vld [vmem:[#allocation9 + $0xf0] sm:$0xff]  ;;  %v292_v58 = vld [vmem:[#allocation9 + $0x108] sm:$0xff] }
  0x57   :  { %v294_v59 = vld [vmem:[#allocation9 + $0x118] sm:$0xff]  ;;  %v547_v60 = vpack.c.bf16 %v289_v57, %v287_v56  ;;  %v291_v62 = vld [vmem:[#allocation9 + $0x100] sm:$0xff]  ;;  %v293_v63 = vld [vmem:[#allocation9 + $0x110] sm:$0xff] }
  0x58   :  { %528 = vmatpush1.bf16.msra.mxu1 %v527_v30  ;;  %v549_v61 = vpack.c.bf16 %v294_v59, %v292_v58  ;;  %v296_v0 = vld [vmem:[#allocation9 + $0x128] sm:$0xff]  ;;  %v298_v1 = vld [vmem:[#allocation9 + $0x138] sm:$0xff]  ;;  %v551_v2 = vpack.c.bf16 %v293_v63, %v291_v62  ;;  %v295_v4 = vld [vmem:[#allocation9 + $0x120] sm:$0xff] }
  0x59   :  { %530 = vmatprep.subr.bf16.mxu1 %v529_v31  ;;  %v553_v3 = vpack.c.bf16 %v298_v1, %v296_v0  ;;  %v297_v5 = vld [vmem:[#allocation9 + $0x130] sm:$0xff]  ;;  %v300_v6 = vld [vmem:[#allocation9 + $0x148] sm:$0xff]  ;;  %v302_v7 = vld [vmem:[#allocation9 + $0x158] sm:$0xff] }
  0x5a   :  { %v555_v8 = vpack.c.bf16 %v297_v5, %v295_v4  ;;  %v557_v9 = vpack.c.bf16 %v302_v7, %v300_v6  ;;  %v299_v10 = vld [vmem:[#allocation9 + $0x140] sm:$0xff]  ;;  %v301_v11 = vld [vmem:[#allocation9 + $0x150] sm:$0xff]  ;;  %v304_v12 = vld [vmem:[#allocation9 + $0x168] sm:$0xff]  ;;  %v410_v4 = vstv %s856_s8 }
  0x5b   :  { %v306_v13 = vld [vmem:[#allocation9 + $0x178] sm:$0xff]  ;;  %v559_v14 = vpack.c.bf16 %v301_v11, %v299_v10  ;;  %v303_v16 = vld [vmem:[#allocation9 + $0x160] sm:$0xff]  ;;  %v305_v17 = vld [vmem:[#allocation9 + $0x170] sm:$0xff] }
  0x5c   :  { %532 = vmatpush1.bf16.msra.mxu1 %v531_v36  ;;  %v561_v15 = vpack.c.bf16 %v306_v13, %v304_v12  ;;  %v308_v18 = vld [vmem:[#allocation9 + $0x188] sm:$0xff]  ;;  %v310_v19 = vld [vmem:[#allocation9 + $0x198] sm:$0xff]  ;;  %v563_v20 = vpack.c.bf16 %v305_v17, %v303_v16  ;;  %v307_v22 = vld [vmem:[#allocation9 + $0x180] sm:$0xff] }
  0x5d   :  { %534 = vmatprep.subr.bf16.mxu1 %v533_v37  ;;  %v565_v21 = vpack.c.bf16 %v310_v19, %v308_v18  ;;  %v309_v23 = vld [vmem:[#allocation9 + $0x190] sm:$0xff]  ;;  %v312_v24 = vld [vmem:[#allocation9 + $0x1a8] sm:$0xff]  ;;  %v314_v25 = vld [vmem:[#allocation9 + $0x1b8] sm:$0xff] }
  0x5e   :  { %v567_v26 = vpack.c.bf16 %v309_v23, %v307_v22  ;;  %v569_v27 = vpack.c.bf16 %v314_v25, %v312_v24  ;;  %v311_v28 = vld [vmem:[#allocation9 + $0x1a0] sm:$0xff]  ;;  %v313_v29 = vld [vmem:[#allocation9 + $0x1b0] sm:$0xff]  ;;  %v316_v30 = vld [vmem:[#allocation9 + $0x1c8] sm:$0xff] }
  0x5f   :  { %v318_v31 = vld [vmem:[#allocation9 + $0x1d8] sm:$0xff]  ;;  %v571_v32 = vpack.c.bf16 %v313_v29, %v311_v28  ;;  %v315_v34 = vld [vmem:[#allocation9 + $0x1c0] sm:$0xff]  ;;  %v317_v35 = vld [vmem:[#allocation9 + $0x1d0] sm:$0xff] }
  0x60   :  { %536 = vmatpush1.bf16.msra.mxu1 %v535_v42  ;;  %v573_v33 = vpack.c.bf16 %v318_v31, %v316_v30  ;;  %v575_v36 = vpack.c.bf16 %v317_v35, %v315_v34  ;;  %v320_v37 = vld [vmem:[#allocation9 + $0x1e8] sm:$0xff]  ;;  %v322_v38 = vld [vmem:[#allocation9 + $0x1f8] sm:$0xff]  ;;  %v319_v40 = vld [vmem:[#allocation9 + $0x1e0] sm:$0xff] }
  0x61   :  { %538 = vmatprep.subr.bf16.mxu1 %v537_v43  ;;  %v577_v39 = vpack.c.bf16 %v322_v38, %v320_v37  ;;  %v321_v41 = vld [vmem:[#allocation9 + $0x1f0] sm:$0xff]  ;;  %v245_v43 = vlaneseq  ;;  %v243_v46 = vld [vmem:[%s852_s4] sm:$0x3] }
  0x62   :  { %v579_v42 = vpack.c.bf16 %v321_v41, %v319_v40  ;;  %v408_v56 = vld [vmem:[%s855_s7] sm:$0x3] }
  0x63   :  { %v246_v44 = vshrl.u32 %v245_v43, 7  ;;  %v323_v58 = vld [vmem:[%s854_s6] sm:$0x3]  ;;  %s679_s6 = scalar_lea.vmem %s501_s22, 16 }
  0x64   :  { %540 = vmatpush1.bf16.msra.mxu1 %v539_v48  ;;  %p680_p4 = scmp.ne.s32.totalorder %s501_s22, %s679_s6  ;;  %p685_p6 = scmp.lt.s32.totalorder %s683_s23, %s679_s6 }
  0x65   :  { %542 = vmatprep.subr.bf16.mxu1 %v541_v49  ;;  %v247_v45 = vsub.s32 0, %v246_v44  ;;  %v251_v47 = vsub.s32 1, %v246_v44 }
  0x66   :  { %p686_p7 = por %p685_p6, %p684_p5 }
  0x67   :  { %v248_v48 = vrot.slane %v243_v46, %v247_v45  ;;  %v252_v49 = vrot.slane %v243_v46, %v251_v47  ;;  %v419_v57 = vrot.slane %v408_v56, %v251_v47  ;;  %v328_v59 = vrot.slane %v323_v58, %v247_v45 }
  0x68   :  { %544 = vmatpush1.bf16.msra.mxu1 %v543_v54  ;;  %p687_p8 = pnand %p686_p7, %p680_p4 }
  0x69   :  { %546 = vmatprep.subr.bf16.mxu1 %v545_v55  ;;  %486 = vmatprep.mubr.f32.mxu0 %v419_v57 }
  0x6c   :  { %548 = vmatpush1.bf16.msra.mxu1 %v547_v60  ;;  %v332_v60 = vrot.slane %v323_v58, %v251_v47 }
  0x6d   :  { %550 = vmatprep.subr.bf16.mxu1 %v549_v61 }
  0x70   :  { %552 = vmatpush1.bf16.msra.mxu1 %v551_v2 }
  0x71   :  { %554 = vmatprep.subr.bf16.mxu1 %v553_v3  ;;  %v415_v3 = vrot.slane %v408_v56, %v247_v45 }
  0x74   :  { %556 = vmatpush1.bf16.msra.mxu1 %v555_v8 }
  0x75   :  { %558 = vmatprep.subr.bf16.mxu1 %v557_v9 }
  0x78   :  { %560 = vmatpush1.bf16.msra.mxu1 %v559_v14 }
  0x79   :  { %562 = vmatprep.subr.bf16.mxu1 %v561_v15 }
  0x7c   :  { %564 = vmatpush1.bf16.msra.mxu1 %v563_v20 }
  0x7d   :  { %566 = vmatprep.subr.bf16.mxu1 %v565_v21 }
  0x80   :  { %568 = vmatpush1.bf16.msra.mxu1 %v567_v26 }
  0x81   :  { %570 = vmatprep.subr.bf16.mxu1 %v569_v27 }
  0x84   :  { %572 = vmatpush1.bf16.msra.mxu1 %v571_v32 }
  0x85   :  { %574 = vmatprep.subr.bf16.mxu1 %v573_v33 }
  0x88   :  { %576 = vmatpush1.bf16.msra.mxu1 %v575_v36 }
  0x89   :  { %578 = vmatprep.subr.bf16.mxu1 %v577_v39 }
  0x8c   :  { %580 = vmatpush1.bf16.msra.mxu1 %v579_v42 }
 0x127   :  { %v238_v50 = vpop.f32.mrb[0].mxu0 }
 0x128   :  { %v255_v51 = vadd.f32 %v248_v48, %v238_v50  ;;  %v240_v52 = vpop.f32.mrb[1].mxu0 }
 0x129   :  { %v256_v53 = vadd.f32 %v252_v49, %v240_v52 }
 0x12a   :  { %v257_v55 = vmax.f32 %v255_v51, 0.0 }
 0x12b   :  { %v258_v54 = vmax.f32 %v256_v53, 0.0 }
 0x12d   :  { %399 = vmatprep.mubr.f32.mxu1 %v258_v54 }
 0x12e   :  { %400 = vmatmul.mubr.f32.vlgmr.msra.gmra.mrb[0].mxu1 %v257_v55 }
 0x201   :  { %v401_v61 = vpop.f32.mrb[0].mxu1 }
 0x202   :  { %v402_v62 = vadd.f32 %v401_v61, %v328_v59  ;;  %v403_v63 = vpop.f32.mrb[1].mxu1 }
 0x203   :  { %v404_v0 = vadd.f32 %v403_v63, %v332_v60 }
 0x204   :  { %v406_v2 = vmax.f32 %v402_v62, 0.0 }
 0x205   :  { %v407_v1 = vmax.f32 %v404_v0, 0.0 }
 0x207   :  { %422 = vmatprep.subr.mxu0 %v407_v1 }
 0x208   :  { %423 = vmatpush1.xpose.msra.mxu0 %v406_v2 }
 0x20b   :  { %487 = vmatmul.mubr.f32.vlgmr.msra.gmra.mrb[2].mxu0 %v415_v3 }
 0x2de   :  { %v488_v5 = vpop.f32.mrb[2].mxu0 }
 0x2df   :  { %v489_v6 = vadd.f32 %v488_v5, %v410_v4  ;;  %v490_v7 = vpop.f32.mrb[3].mxu0 }
 0x2e1   :  { %493 = vst.msk [vmem:[#allocation11] sm:$0x1] %vm492_vm2, %v489_v6 }
 0x2e2   :  { %690 = shalt.err (!%p687_p8)
}
 0x2e3   :  { %s691_s8 = scalar_lea.hbm %s857_s9, 16 }
 0x2e4   :  { %p692_p9 = scmp.ne.s32.totalorder %s857_s9, %s691_s8  ;;  %p695_p10 = scmp.lt.u32.totalorder %s691_s8, %s857_s9 }
 0x2e6   :  { %p697_p11 = pnand %p695_p10, %p692_p9 }
 0x2e8   :  { %700 = shalt.err (!%p697_p11)
}
 0x2e9   :  { %503 = dma.vmem_to_hbm [thread:$0]  %s501_s22, 16, %s857_s9, [#allocation5]  }
 0x2ea   :  { %707 = dma.done.wait [#allocation5], 16  }
 0x2eb   :  { %708 = vsyncadd [#allocation5], 4294967280 }
 0x2ec   :  { %507 = vsyncpa [#allocation4], 1 }
 0x2ed   :  { %508 = vsyncpa [#allocation7], 1 }
 0x2ee   :  { %509 = vsyncpa [#allocation10], 1 }
 0x2ef   :  { %510 = vsyncpa [#allocation5], 1 }

</bundles_post_ra>
